<compile_context>
chip_gen: v7x
topology: tpu7x:2x2x1
jax: 0.10.0
libtpu: 0.0.40
codegen_flags: <defaults>
</compile_context>

<pallas_src>
import functools

import jax
import jax.numpy as jnp
from jax import lax
from jax.experimental import pallas as pl
from jax.experimental.pallas import tpu as pltpu


def _conv_bn_relu_kernel(patches_ref, w_ref, gb_ref, out_ref, *,
                         n_images, hw, inv_nhw, eps):
    """Fused conv3x3 (one im2col matmul) + train-mode BN + ReLU.

    patches_ref : (K_pad, N*H*W)   im2col patch matrix (K-order = dy,dx,ci,
                                   zero-padded rows), VMEM
    w_ref       : (C_out, K_pad)   conv weights flattened to match, VMEM
    gb_ref      : (C_out, 2)       BN gamma (col 0) / beta (col 1), VMEM
    out_ref     : (N, C_out, H*W)  per-image lane-dense output, VMEM
    """
    # Single MXU matmul, lane-dense result (spatial on the lane axis).
    acc = jnp.dot(w_ref[...], patches_ref[...],
                  preferred_element_type=jnp.float32)           # (C_out, NHW)

    # Training-mode BatchNorm2d stats over (N, H, W) == the lane axis.
    # One pass: sum + sum-of-squares, biased variance (clamped >= 0).
    mean = jnp.sum(acc, axis=1, keepdims=True) * inv_nhw        # (C_out, 1)
    mean_sq = jnp.sum(acc * acc, axis=1, keepdims=True) * inv_nhw
    var = jnp.maximum(mean_sq - mean * mean, 0.0)               # FP-cancel guard
    inv_std = lax.rsqrt(var + eps)

    # Fold BN into a single affine pass, then ReLU.
    scale = gb_ref[:, 0:1] * inv_std                            # (C_out, 1)
    shift = gb_ref[:, 1:2] - mean * scale                       # (C_out, 1)
    y = jnp.maximum(acc * scale + shift, 0.0).astype(out_ref.dtype)

    # Store directly in (N, C_out, HW) layout: one unmasked lane-dense slice
    # per image (HW = 256 lanes, multiple of 128) -> no wrapper-side transpose.
    for n in range(n_images):
        out_ref[n] = y[:, n * hw:(n + 1) * hw]


@jax.jit
def layer_forward(x_nchw, w_oihw, gamma, beta):
    """Pallas equivalent of Layer.forward (active=True, training-mode BN).

    x_nchw : (N, C_in, H, W)     float32
    w_oihw : (C_out, C_in, 3, 3) conv weight (PyTorch layout), no bias
    gamma, beta : (C_out,)       BN affine params
    returns: (N, C_out, H, W)    float32
    """
    eps = 1e-5
    N, C_in, H, W = x_nchw.shape
    C_out = w_oihw.shape[0]
    hw = H * W
    nhw = N * hw
    k = 9 * C_in
    k_pad = ((k + 7) // 8) * 8          # pad contraction dim to sublane multiple

    # --- glue (fused by XLA under jit): pad + im2col + weight reshape -------
    # TODO(synk): at realistic sizes build the 9 taps in-kernel (per NHW tile)
    # instead of this 9x HBM-expanded patch matrix.
    x_pad = jnp.pad(x_nchw, ((0, 0), (0, 0), (1, 1), (1, 1)))   # (N,Cin,H+2,W+2)
    taps = [x_pad[:, :, dy:dy + H, dx:dx + W]
            for dy in range(3) for dx in range(3)]              # 9 x (N,Cin,H,W)
    patches = jnp.stack(taps, axis=0)                           # (9,N,Cin,H,W)
    # row index = (dy*3+dx)*C_in + ci ; col index = n*H*W + h*W + w
    patches = patches.transpose(0, 2, 1, 3, 4).reshape(k, nhw)  # (9*Cin, NHW)
    patches = jnp.pad(patches, ((0, k_pad - k), (0, 0)))        # (K_pad, NHW)

    # OIHW -> (C_out, dy, dx, ci) -> (C_out, 9*C_in), matching patch K order.
    w2d = w_oihw.transpose(0, 2, 3, 1).reshape(C_out, k)
    w2d = jnp.pad(w2d, ((0, 0), (0, k_pad - k)))                # (C_out, K_pad)

    # Pack gamma/beta into one small VMEM operand.
    gb = jnp.stack([gamma, beta], axis=1)                       # (C_out, 2)

    kernel = functools.partial(_conv_bn_relu_kernel,
                               n_images=N, hw=hw,
                               inv_nhw=1.0 / nhw, eps=eps)

    flops = 2 * C_out * k_pad * nhw + 8 * C_out * nhw
    bytes_accessed = 4 * (k_pad * nhw + C_out * k_pad + 2 * C_out + C_out * nhw)

    # Tiny problem: everything fits in VMEM -> single grid step, full blocks.
    out3d = pl.pallas_call(
        kernel,
        out_shape=jax.ShapeDtypeStruct((N, C_out, hw), jnp.float32),
        in_specs=[
            pl.BlockSpec(memory_space=pltpu.VMEM),   # patches
            pl.BlockSpec(memory_space=pltpu.VMEM),   # w2d
            pl.BlockSpec(memory_space=pltpu.VMEM),   # gamma/beta
        ],
        out_specs=pl.BlockSpec(memory_space=pltpu.VMEM),
        cost_estimate=pl.CostEstimate(flops=flops,
                                      transcendentals=C_out,
                                      bytes_accessed=bytes_accessed),
    )(patches, w2d, gb)

    # (N, C_out, H*W) -> (N, C_out, H, W): reshape only, no transpose/HBM pass.
    return out3d.reshape(N, C_out, H, W)


def _reference(x_nchw, w_oihw, gamma, beta, eps=1e-5):
    """Pure-JAX reference: conv3x3(pad=1, no bias) + train-mode BN + ReLU."""
    y = lax.conv_general_dilated(
        x_nchw, w_oihw, window_strides=(1, 1), padding=((1, 1), (1, 1)),
        dimension_numbers=("NCHW", "OIHW", "NCHW"))
    mean = jnp.mean(y, axis=(0, 2, 3), keepdims=True)
    var = jnp.mean((y - mean) ** 2, axis=(0, 2, 3), keepdims=True)
    y = (y - mean) * lax.rsqrt(var + eps)
    y = y * gamma.reshape(1, -1, 1, 1) + beta.reshape(1, -1, 1, 1)
    return jnp.maximum(y, 0.0)


if __name__ == "__main__":
    # Small shapes consistent with the module: Conv2d(n_in=4, n_out=8, k=3, pad=1).
    N, C_in, C_out, H, W = 2, 4, 8, 16, 16

    key = jax.random.PRNGKey(0)
    kx, kw = jax.random.split(key)
    x = jax.random.normal(kx, (N, C_in, H, W), dtype=jnp.float32)
    fan_in = C_in * 3 * 3
    w = jax.random.normal(kw, (C_out, C_in, 3, 3), dtype=jnp.float32) * (2.0 / fan_in) ** 0.5
    gamma = jnp.ones((C_out,), dtype=jnp.float32)   # BatchNorm2d default init
    beta = jnp.zeros((C_out,), dtype=jnp.float32)

    out = jax.block_until_ready(layer_forward(x, w, gamma, beta))

    ref = jax.block_until_ready(_reference(x, w, gamma, beta))
    assert out.shape == (N, C_out, H, W)
    assert jnp.allclose(out, ref, rtol=1e-4, atol=1e-4), float(jnp.max(jnp.abs(out - ref)))

    print("KERNEL_OK")
</pallas_src>

<mosaic_0001>
module attributes {stable_mosaic.version = 11 : i64} {
  func.func @_conv_bn_relu_kernel(%arg0: memref<40x512xf32, #tpu.memory_space<vmem>>, %arg1: memref<8x40xf32, #tpu.memory_space<vmem>>, %arg2: memref<8x2xf32, #tpu.memory_space<vmem>>, %arg3: memref<2x8x256xf32, #tpu.memory_space<vmem>>) attributes {dimension_semantics = [], scalar_prefetch = 0 : i64, scratch_operands = 0 : i64, tpu.core_type = #tpu.core_type<tc>} {
    %c0 = arith.constant 0 : index
    %c0_0 = arith.constant 0 : index
    %0 = vector.load %arg1[%c0, %c0_0] : memref<8x40xf32, #tpu.memory_space<vmem>>, vector<8x40xf32>
    %c0_1 = arith.constant 0 : index
    %c0_2 = arith.constant 0 : index
    %1 = vector.load %arg0[%c0_1, %c0_2] : memref<40x512xf32, #tpu.memory_space<vmem>>, vector<40x512xf32>
    %cst = arith.constant dense<0.000000e+00> : vector<8x512xf32>
    %2 = tpu.matmul %0, %1, %cst {dimension_numbers = #tpu.dot_dimension_numbers<[1], [0], [0], [1], [0, 0, 1, 1], [], []>} : vector<8x40xf32>, vector<40x512xf32>, vector<8x512xf32> -> vector<8x512xf32>
    %cst_3 = arith.constant dense<0.000000e+00> : vector<8xf32>
    %3 = vector.multi_reduction <add>, %2, %cst_3 [1] : vector<8x512xf32> to vector<8xf32>
    %4 = vector.shape_cast %3 : vector<8xf32> to vector<8x1xf32>
    %cst_4 = arith.constant 0.001953125 : f32
    %5 = vector.broadcast %cst_4 : f32 to vector<8x1xf32>
    %6 = arith.mulf %4, %5 : vector<8x1xf32>
    %7 = arith.mulf %2, %2 : vector<8x512xf32>
    %cst_5 = arith.constant dense<0.000000e+00> : vector<8xf32>
    %8 = vector.multi_reduction <add>, %7, %cst_5 [1] : vector<8x512xf32> to vector<8xf32>
    %9 = vector.shape_cast %8 : vector<8xf32> to vector<8x1xf32>
    %cst_6 = arith.constant 0.001953125 : f32
    %10 = vector.broadcast %cst_6 : f32 to vector<8x1xf32>
    %11 = arith.mulf %9, %10 : vector<8x1xf32>
    %12 = arith.mulf %6, %6 : vector<8x1xf32>
    %13 = arith.subf %11, %12 : vector<8x1xf32>
    %cst_7 = arith.constant 0.000000e+00 : f32
    %14 = vector.broadcast %cst_7 : f32 to vector<8x1xf32>
    %15 = arith.maximumf %13, %14 : vector<8x1xf32>
    %cst_8 = arith.constant 9.99999974E-6 : f32
    %16 = vector.broadcast %cst_8 : f32 to vector<8x1xf32>
    %17 = arith.addf %15, %16 : vector<8x1xf32>
    %18 = math.rsqrt %17 : vector<8x1xf32>
    %c0_9 = arith.constant 0 : index
    %c0_10 = arith.constant 0 : index
    %19 = vector.load %arg2[%c0_9, %c0_10] : memref<8x2xf32, #tpu.memory_space<vmem>>, vector<8x1xf32>
    %20 = arith.mulf %19, %18 : vector<8x1xf32>
    %c0_11 = arith.constant 0 : index
    %c1 = arith.constant 1 : index
    %21 = vector.load %arg2[%c0_11, %c1] : memref<8x2xf32, #tpu.memory_space<vmem>>, vector<8x1xf32>
    %22 = arith.mulf %6, %20 : vector<8x1xf32>
    %23 = arith.subf %21, %22 : vector<8x1xf32>
    %24 = vector.broadcast %20 : vector<8x1xf32> to vector<8x512xf32>
    %25 = arith.mulf %2, %24 : vector<8x512xf32>
    %26 = vector.broadcast %23 : vector<8x1xf32> to vector<8x512xf32>
    %27 = arith.addf %25, %26 : vector<8x512xf32>
    %cst_12 = arith.constant 0.000000e+00 : f32
    %28 = vector.broadcast %cst_12 : f32 to vector<8x512xf32>
    %29 = arith.maximumf %27, %28 : vector<8x512xf32>
    %30 = vector.extract_strided_slice %29 {offsets = [0, 0], sizes = [8, 256], strides = [1, 1]} : vector<8x512xf32> to vector<8x256xf32>
    %c0_13 = arith.constant 0 : index
    %c0_14 = arith.constant 0 : index
    %c0_15 = arith.constant 0 : index
    %31 = vector.load %arg3[%c0_13, %c0_14, %c0_15] : memref<2x8x256xf32, #tpu.memory_space<vmem>>, vector<1x8x256xf32>
    %32 = vector.shape_cast %31 : vector<1x8x256xf32> to vector<8x256xf32>
    %33 = vector.shape_cast %30 : vector<8x256xf32> to vector<1x8x256xf32>
    tpu.vector_store %arg3[%c0_13, %c0_14, %c0_15], %33 {strides = array<i32>} : memref<2x8x256xf32, #tpu.memory_space<vmem>>, vector<1x8x256xf32>,
    %34 = vector.extract_strided_slice %29 {offsets = [0, 256], sizes = [8, 256], strides = [1, 1]} : vector<8x512xf32> to vector<8x256xf32>
    %c1_16 = arith.constant 1 : index
    %c0_17 = arith.constant 0 : index
    %c0_18 = arith.constant 0 : index
    %35 = vector.load %arg3[%c1_16, %c0_17, %c0_18] : memref<2x8x256xf32, #tpu.memory_space<vmem>>, vector<1x8x256xf32>
    %36 = vector.shape_cast %35 : vector<1x8x256xf32> to vector<8x256xf32>
    %37 = vector.shape_cast %34 : vector<8x256xf32> to vector<1x8x256xf32>
    tpu.vector_store %arg3[%c1_16, %c0_17, %c0_18], %37 {strides = array<i32>} : memref<2x8x256xf32, #tpu.memory_space<vmem>>, vector<1x8x256xf32>,
    return
  }
}

</mosaic_0001>

<bundles_post_ra>
// kernel: layer_forward.1
= control target key start
LH: loop header
LB: loop body
LE: loop exit
PB: predicated region body
PF: predicated region fallthrough
CT: control target
= control target key end

     0   :  { %v269_v3 = vmov 0.0   ;;  %vm35_vm0 = vcmask 326656   ;;  %v270_v44 = vmov 0   ;;  %v271_v53 = vmov 1   ;;  %s272_s27 = smov 1   ;;  %s371_s0 = inlined_call_operand.vmem [shape: f32[40,512], index: 0, kind: input, shape index: {}]   ;;  %s372_s1 = inlined_call_operand.vmem [shape: f32[8,40], index: 1, kind: input, shape index: {}]   ;;  %s373_s2 = inlined_call_operand.vmem [shape: f32[8,2], index: 2, kind: input, shape index: {}]   ;;  %s374_s3 = inlined_call_operand.vmem [shape: f32[2,8,256], index: 3, kind: output, shape index: {}]  }
   0x1   :  { %v16_v0 = vld [vmem:[%s371_s0 + $0x8] sm:$0xff]  ;;  %v15_v2 = vld [vmem:[%s371_s0] sm:$0xff]  ;;  %103 = vmatprep.mubr.f32.mxu0 %v269_v3  ;;  %174 = vmatprep.mubr.f32.mxu1 %v269_v3  ;;  %v18_v6 = vld [vmem:[%s371_s0 + $0x18] sm:$0xff] }
   0x2   :  { %v20_v1 = vld [vmem:[%s371_s0 + $0x28] sm:$0xff]  ;;  %v19_v5 = vld [vmem:[%s371_s0 + $0x20] sm:$0xff]  ;;  %v22_v7 = vld [vmem:[%s371_s0 + $0x38] sm:$0xff]  ;;  %265 = vset.pattern.permute.xlu1 %v270_v44  ;;  %266 = vset.pattern.permute.xlu0 %v271_v53 }
   0x3   :  { %v245_v4 = vpack.c.bf16 %v20_v1, %v16_v0  ;;  %v247_v8 = vpack.c.bf16 %v19_v5, %v15_v2  ;;  %v253_v9 = vpack.c.bf16 %v22_v7, %v18_v6  ;;  %v17_v10 = vld [vmem:[%s371_s0 + $0x10] sm:$0xff]  ;;  %v24_v12 = vld [vmem:[%s371_s0 + $0x48] sm:$0xff]  ;;  %v23_v15 = vld [vmem:[%s371_s0 + $0x40] sm:$0xff] }
   0x4   :  { %v21_v11 = vld [vmem:[%s371_s0 + $0x30] sm:$0xff]  ;;  %v28_v14 = vld [vmem:[%s371_s0 + $0x68] sm:$0xff]  ;;  %v27_v16 = vld [vmem:[%s371_s0 + $0x60] sm:$0xff] }
   0x5   :  { %246 = vmatprep.subr.bf16.mxu0 %v245_v4  ;;  %v255_v13 = vpack.c.bf16 %v21_v11, %v17_v10  ;;  %254 = vmatprep.subr.bf16.mxu1 %v253_v9  ;;  %v249_v17 = vpack.c.bf16 %v28_v14, %v24_v12  ;;  %v251_v18 = vpack.c.bf16 %v27_v16, %v23_v15  ;;  %v26_v19 = vld [vmem:[%s371_s0 + $0x58] sm:$0xff]  ;;  %v25_v21 = vld [vmem:[%s371_s0 + $0x50] sm:$0xff]  ;;  %v32_v25 = vld [vmem:[%s371_s0 + $0x88] sm:$0xff] }
   0x6   :  { %248 = vmatpush1.bf16.msra.mxu0 %v247_v8  ;;  %v30_v20 = vld [vmem:[%s371_s0 + $0x78] sm:$0xff]  ;;  %v29_v23 = vld [vmem:[%s371_s0 + $0x70] sm:$0xff]  ;;  %v31_v27 = vld [vmem:[%s371_s0 + $0x80] sm:$0xff] }
   0x7   :  { %256 = vmatpush1.bf16.msra.mxu1 %v255_v13  ;;  %v257_v22 = vpack.c.bf16 %v30_v20, %v26_v19  ;;  %250 = vmatprep.subr.bf16.mxu0 %v249_v17  ;;  %v259_v24 = vpack.c.bf16 %v29_v23, %v25_v21  ;;  %v34_v26 = vld [vmem:[%s371_s0 + $0x98] sm:$0xff]  ;;  %v14_v28 = vld [vmem:[%s372_s1] sm:$0xff]  ;;  %v33_v29 = vld [vmem:[%s371_s0 + $0x90] sm:$0xff] }
   0x8   :  { %v202_v54 = vld [vmem:[%s373_s2] sm:$0xff] }
   0x9   :  { %258 = vmatprep.subr.bf16.mxu1 %v257_v22 }
   0xa   :  { %252 = vmatpush1.bf16.msra.mxu0 %v251_v18 }
   0xb   :  { %260 = vmatpush1.bf16.msra.mxu1 %v259_v24  ;;  %47 = vmatprep.subr.mxu0 %v32_v25 }
   0xc   :  { %118 = vmatprep.subr.mxu1 %v34_v26 }
   0xe   :  { %48 = vmatpush1.msra.mxu0 %v31_v27 }
   0xf   :  { %241 = vmatmul.mubr.msk.f32.vlgmr.msra.gmra.mrb[0].mxu0 %vm35_vm0, %v14_v28  ;;  %119 = vmatpush1.msra.mxu1 %v33_v29 }
  0x10   :  { %242 = vmatmul.mubr.msk.f32.vlgmr.msra.gmra.mrb[0].mxu1 %vm35_vm0, %v14_v28 }
  0xe2   :  { %v105_v30 = vpop.f32.mrb[0].mxu0 }
  0xe3   :  { %v187_v31 = vmul.f32 %v105_v30, %v105_v30  ;;  %v107_v32 = vpop.f32.mrb[1].mxu0  ;;  %v176_v33 = vpop.f32.mrb[0].mxu1 }
  0xe4   :  { %v181_v34 = vadd.f32 %v107_v32, %v105_v30  ;;  %v188_v35 = vmul.f32 %v107_v32, %v107_v32  ;;  %v189_v36 = vmul.f32 %v176_v33, %v176_v33  ;;  %v178_v37 = vpop.f32.mrb[1].mxu1 }
  0xe5   :  { %v190_v40 = vmul.f32 %v178_v37, %v178_v37 }
  0xe6   :  { %v191_v38 = vadd.f32 %v188_v35, %v187_v31  ;;  %v182_v39 = vadd.f32 %v181_v34, %v176_v33 }
  0xe8   :  { %v183_v41 = vadd.f32 %v182_v39, %v178_v37  ;;  %v192_v42 = vadd.f32 %v191_v38, %v189_v36 }
  0xea   :  { %184 = vadd.xlane.f32.xlu0 %v183_v41  ;;  %v193_v43 = vadd.f32 %v192_v42, %v190_v40 }
  0xee   :  { %194 = vadd.xlane.f32.xlu0 %v193_v43 }
 0x177   :  { %v185_v45 = vpop.xlane.xlu0 %184 }
 0x178   :  { %v186_v46 = vmul.f32 0.001953125, %v185_v45 }
 0x17a   :  { %v197_v48 = vmul.f32 %v186_v46, %v186_v46 }
 0x17b   :  { %v195_v47 = vpop.xlane.xlu0 %194 }
 0x17c   :  { %v196_v49 = vmul.f32 0.001953125, %v195_v47 }
 0x17e   :  { %v198_v50 = vsub.f32 %v196_v49, %v197_v48 }
 0x180   :  { %v199_v51 = vmax.f32 %v198_v50, 0.0 }
 0x182   :  { %v200_v52 = vadd.f32 1e-05, %v199_v51 }
 0x184   :  { %267 = vrsqrt.f32 %v200_v52 }
 0x18e   :  { %v268_v55 = vpop.eup %267 }
 0x18f   :  { %v203_v56 = vmul.f32 %v268_v55, %v202_v54 }
 0x191   :  { %v204_v57 = vmul.f32 %v203_v56, %v186_v46 }
 0x193   :  { %206 = vrot.lane.b32.xlu1 %v204_v57, %s272_s27 }
 0x197   :  { %212 = vperm.xlu1 %265, %v203_v56  }
 0x205   :  { %v207_v58 = vpop.permute.xlu1 %206 }
 0x206   :  { %v209_v59 = vsub.f32 %v202_v54, %v207_v58 }
 0x208   :  { %221 = vperm.xlu0 %266, %v209_v59  }
 0x216   :  { %v213_v60 = vpop.permute.xlu1 %212 }
 0x217   :  { %v215_v61 = vmul.f32 %v213_v60, %v105_v30  ;;  %v216_v62 = vmul.f32 %v213_v60, %v107_v32  ;;  %v217_v63 = vmul.f32 %v213_v60, %v176_v33  ;;  %v218_v0 = vmul.f32 %v213_v60, %v178_v37 }
 0x287   :  { %v222_v1 = vpop.permute.xlu0 %221 }
 0x288   :  { %v224_v2 = vadd.f32 %v222_v1, %v215_v61  ;;  %v225_v3 = vadd.f32 %v222_v1, %v216_v62  ;;  %v226_v4 = vadd.f32 %v222_v1, %v217_v63  ;;  %v227_v5 = vadd.f32 %v222_v1, %v218_v0 }
 0x28a   :  { %v228_v6 = vmax.f32 %v224_v2, 0.0  ;;  %v229_v7 = vmax.f32 %v225_v3, 0.0  ;;  %v230_v8 = vmax.f32 %v226_v4, 0.0  ;;  %v231_v9 = vmax.f32 %v227_v5, 0.0 }
 0x28c   :  { %232 = vst [vmem:[%s374_s3] sm:$0xff] %v228_v6  ;;  %233 = vst [vmem:[%s374_s3 + $0x8] sm:$0xff] %v229_v7 }
 0x28d   :  { %243 = vst [vmem:[%s374_s3 + $0x10] sm:$0xff] %v230_v8  ;;  %244 = vst [vmem:[%s374_s3 + $0x18] sm:$0xff] %v231_v9 }

</bundles_post_ra>
